<compile_context>
chip_gen: v5e
topology: v5e:2x2
jax: 0.10.0
libtpu: 0.0.40
codegen_flags: <defaults>
</compile_context>

<pallas_src>
import functools

import jax
import jax.numpy as jnp
from jax.experimental import pallas as pl
from jax.experimental.pallas import tpu as pltpu


def _dice_sums_kernel(logits_ref, tgt_ref, inter_ref, psum_ref, tsum_ref,
                      vcnt_ref, *, ignore_index, hw):
    """One (split, batch, pixel-tile) grid step.

    logits_ref : (C, TILE)  class-major logits (any float dtype)
    tgt_ref    : (1, TILE)  integer labels
    inter/psum/tsum_ref : (C, 1) f32 accumulators, resident across the tile axis
    vcnt_ref   : (1, 1) f32 valid-pixel counter
    """
    i = pl.program_id(2)

    @pl.when(i == 0)
    def _():
        inter_ref[...] = jnp.zeros_like(inter_ref)
        psum_ref[...] = jnp.zeros_like(psum_ref)
        tsum_ref[...] = jnp.zeros_like(tsum_ref)
        vcnt_ref[...] = jnp.zeros_like(vcnt_ref)

    logits = logits_ref[...].astype(jnp.float32)              # (C, TILE)
    C, tile = logits.shape

    # Ragged-tail handling (replaces the old jnp.pad + extra HBM pass):
    # global pixel index of every lane in this logical pixel tile.
    tile_idx = pl.program_id(0) * pl.num_programs(2) + i
    lane = jax.lax.broadcasted_iota(jnp.int32, (1, tile), 1)
    in_bounds = (tile_idx * tile + lane) < hw                  # (1, TILE)

    tgt = tgt_ref[...].astype(jnp.int32)                       # (1, TILE)
    valid = (tgt != ignore_index) & in_bounds                  # (1, TILE)

    # Softmax over the class (sublane) axis.
    m = jnp.max(logits, axis=0, keepdims=True)                 # (1, TILE)
    e = jnp.exp(logits - m)                                    # (C, TILE)
    inv = pl.reciprocal(jnp.sum(e, axis=0, keepdims=True), approx=False)
    p = e * inv                                                # (C, TILE)

    class_ids = jax.lax.broadcasted_iota(jnp.int32, (C, tile), 0)
    hit = (tgt == class_ids) & valid                           # (C, TILE)

    # where() (not multiply) so garbage values in the out-of-bounds tail lanes
    # can never leak (even as NaN*0) into the sums.
    p_valid = jnp.where(valid, p, 0.0)
    inter_c = jnp.where(hit, p, 0.0)
    hit_f = hit.astype(jnp.float32)

    # Per-tile cross-lane reduce (XLU) straight into the tiny resident outputs:
    # no (C, TILE) accumulators, no big finalize reduce, minimal store traffic.
    inter_ref[...] += jnp.sum(inter_c, axis=1, keepdims=True)
    psum_ref[...] += jnp.sum(p_valid, axis=1, keepdims=True)
    tsum_ref[...] += jnp.sum(hit_f, axis=1, keepdims=True)
    vcnt_ref[...] += jnp.sum(valid.astype(jnp.float32), axis=1, keepdims=True)


def _vmem_capacity_bytes():
    """Per-generation VMEM capacity (v5e/v6e: 128 MiB, v7x: 64 MiB per TC)."""
    try:
        return int(pltpu.get_tpu_info().vmem_capacity_bytes)
    except Exception:  # unknown backend / older API: assume the smallest (v7x)
        return 64 * 1024 * 1024


def dice_loss_pallas(pred, target, *, smooth=1.0, ignore_index=255,
                     weight=None, tile_n=32768):
    """pred: [B, C, H, W] float (f32 or bf16); target: [B, H, W] int.

    Returns the scalar DiceLoss (f32), matching the PyTorch module forward.
    """
    B, C, H, W = pred.shape
    HW = H * W

    # Free reshapes only: no transpose, no pad, no dtype change of the logits.
    logits = pred.reshape(B, C, HW)
    tgt = target.reshape(B, 1, HW)
    # Keep narrow integer label dtypes to save HBM traffic; only widen dtypes
    # that cannot represent ignore_index (e.g. int8 cannot hold 255).
    _ok_label_dtypes = (jnp.int32, jnp.uint32, jnp.int16, jnp.uint16, jnp.uint8)
    if not any(tgt.dtype == jnp.dtype(d) for d in _ok_label_dtypes):
        tgt = tgt.astype(jnp.int32)

    # --- per-generation tile sizing ------------------------------------------
    vmem_cap = _vmem_capacity_bytes()
    # Double-buffered logits + double-buffered target + ~4 live (C, TILE) f32
    # temporaries in the body (softmax / masks).  Outputs are (C, 1): tiny.
    bytes_per_col = (2 * C * logits.dtype.itemsize
                     + 2 * tgt.dtype.itemsize
                     + 4 * C * 4)
    vmem_budget = int(vmem_cap * 0.45)
    max_tile = max(128, (vmem_budget // bytes_per_col) // 128 * 128)
    hw_lanes = pl.cdiv(HW, 128) * 128
    tile = int(min(tile_n, max_tile, hw_lanes))
    n_tiles = pl.cdiv(HW, tile)

    # --- megacore split for tiny batch ---------------------------------------
    # With B == 1 the "parallel" batch axis would leave v7x's second TensorCore
    # idle, so split the pixel-tile range in two (a harmless extra loop level
    # on single-TC v5e/v6e).
    splits = 2 if (B == 1 and n_tiles >= 2) else 1
    chunk = pl.cdiv(n_tiles, splits)
    last_tile = n_tiles - 1

    def in_map(s, b, i):
        # Clamp so a (rare) overhang step of an odd split re-reads the last
        # tile; its contributions are masked to zero in-kernel.
        return (b, 0, jnp.minimum(s * chunk + i, last_tile))

    out_map = lambda s, b, i: (s, b, 0, 0)

    vmem_limit = int(min(max(bytes_per_col * tile + (4 << 20), 32 << 20),
                         int(vmem_cap * 0.7)))

    kernel = functools.partial(_dice_sums_kernel,
                               ignore_index=ignore_index, hw=HW)

    out_shape = (
        jax.ShapeDtypeStruct((splits, B, C, 1), jnp.float32),  # intersection
        jax.ShapeDtypeStruct((splits, B, C, 1), jnp.float32),  # softmax sum
        jax.ShapeDtypeStruct((splits, B, C, 1), jnp.float32),  # one-hot sum
        jax.ShapeDtypeStruct((splits, B, 1, 1), jnp.float32),  # valid count
    )

    inter_sb, psum_sb, tsum_sb, vcnt_sb = pl.pallas_call(
        kernel,
        out_shape=out_shape,
        grid_spec=pltpu.PrefetchScalarGridSpec(
            num_scalar_prefetch=0,
            grid=(splits, B, chunk),
            in_specs=[
                # TODO(synk): consider pipeline_mode=pl.Buffered(3) on v7x if a
                # bundle dump shows exposed DMA at tile boundaries.
                pl.BlockSpec((None, C, tile), in_map),
                pl.BlockSpec((None, 1, tile), in_map),
            ],
            out_specs=[
                pl.BlockSpec((None, None, C, 1), out_map),
                pl.BlockSpec((None, None, C, 1), out_map),
                pl.BlockSpec((None, None, C, 1), out_map),
                pl.BlockSpec((None, None, 1, 1), out_map),
            ],
        ),
        compiler_params=pltpu.CompilerParams(
            dimension_semantics=("parallel", "parallel", "arbitrary"),
            vmem_limit_bytes=vmem_limit,
        ),
    )(logits, tgt)

    # Tiny JAX epilogue: combine the per-(split, batch) partial sums.
    inter = jnp.sum(inter_sb[..., 0], axis=(0, 1))   # (C,)
    psum = jnp.sum(psum_sb[..., 0], axis=(0, 1))     # (C,)
    tsum = jnp.sum(tsum_sb[..., 0], axis=(0, 1))     # (C,)
    num_valid = jnp.sum(vcnt_sb)                     # scalar

    # Per-class dice only for classes present among valid pixels (else 0),
    # matching `if target_one_hot[:, i].sum() > 0`; mean over all C classes.
    present = tsum > 0.0
    dice = jnp.where(present,
                     (2.0 * inter + smooth) / (psum + tsum + smooth),
                     0.0)
    if weight is not None:
        dice = dice * jnp.asarray(weight, jnp.float32)
    loss = 1.0 - jnp.mean(dice)

    # PyTorch: `if target_valid.numel() == 0: return 0.0`.
    return jnp.where(num_valid > 0.0, loss, 0.0).astype(jnp.float32)


def dice_loss_ref(pred, target, *, smooth=1.0, ignore_index=255, weight=None):
    """Pure-JAX reference mirroring the PyTorch forward."""
    B, C, H, W = pred.shape
    p = jax.nn.softmax(pred.astype(jnp.float32), axis=1)
    p = jnp.transpose(p, (0, 2, 3, 1)).reshape(-1, C)
    t = target.reshape(-1).astype(jnp.int32)
    valid = (t != ignore_index)
    one_hot = ((t[:, None] == jnp.arange(C)[None, :]) & valid[:, None])
    one_hot = one_hot.astype(jnp.float32)
    p_valid = p * valid[:, None].astype(jnp.float32)
    inter = jnp.sum(p_valid * one_hot, axis=0)
    psum = jnp.sum(p_valid, axis=0)
    tsum = jnp.sum(one_hot, axis=0)
    dice = jnp.where(tsum > 0,
                     (2.0 * inter + smooth) / (psum + tsum + smooth), 0.0)
    if weight is not None:
        dice = dice * jnp.asarray(weight, jnp.float32)
    loss = 1.0 - jnp.mean(dice)
    return jnp.where(jnp.sum(valid) > 0, loss, 0.0)


if __name__ == "__main__":
    key = jax.random.PRNGKey(0)
    k1, k2, k3 = jax.random.split(key, 3)

    # Case 1: baseline small shape, f32 logits, ~10% ignored pixels.
    B, C, H, W = 2, 4, 16, 16
    pred = jax.random.normal(k1, (B, C, H, W), dtype=jnp.float32)
    target = jax.random.randint(k2, (B, H, W), 0, C, dtype=jnp.int32)
    ignore_mask = jax.random.bernoulli(k3, 0.1, (B, H, W))
    target = jnp.where(ignore_mask, 255, target)

    loss = jax.block_until_ready(dice_loss_pallas(pred, target))
    ref = dice_loss_ref(pred, target)
    assert jnp.allclose(loss, ref, atol=1e-5, rtol=1e-5), (loss, ref)

    # Case 2: bf16 logits, B == 1 (exercises the pixel-range megacore split),
    # odd class count, and a ragged last pixel tile (in-kernel tail masking).
    B2, C2, H2, W2 = 1, 5, 17, 16
    k4, k5, k6 = jax.random.split(jax.random.PRNGKey(1), 3)
    pred2 = jax.random.normal(k4, (B2, C2, H2, W2),
                              dtype=jnp.float32).astype(jnp.bfloat16)
    target2 = jax.random.randint(k5, (B2, H2, W2), 0, C2, dtype=jnp.int32)
    target2 = jnp.where(jax.random.bernoulli(k6, 0.15, (B2, H2, W2)),
                        255, target2)

    loss2 = jax.block_until_ready(dice_loss_pallas(pred2, target2, tile_n=128))
    ref2 = dice_loss_ref(pred2, target2)
    assert jnp.allclose(loss2, ref2, atol=1e-5, rtol=1e-5), (loss2, ref2)

    # Case 3: all pixels ignored -> loss must be exactly 0.0.
    target3 = jnp.full((B, H, W), 255, dtype=jnp.int32)
    loss3 = jax.block_until_ready(dice_loss_pallas(pred, target3))
    assert jnp.allclose(loss3, 0.0), loss3

    print("KERNEL_OK")
</pallas_src>

<mosaic_0001>
module attributes {stable_mosaic.version = 11 : i64} {
  func.func @_dice_sums_kernel(%arg0: i32, %arg1: i32, %arg2: i32, %arg3: memref<1x4x256xf32, #tpu.memory_space<vmem>>, %arg4: memref<1x1x256xi32, #tpu.memory_space<vmem>>, %arg5: memref<1x1x4x1xf32, #tpu.memory_space<vmem>>, %arg6: memref<1x1x4x1xf32, #tpu.memory_space<vmem>>, %arg7: memref<1x1x4x1xf32, #tpu.memory_space<vmem>>, %arg8: memref<1x1x1x1xf32, #tpu.memory_space<vmem>>) attributes {dimension_semantics = [#tpu.dimension_semantics<parallel>, #tpu.dimension_semantics<parallel>, #tpu.dimension_semantics<arbitrary>], iteration_bounds = array<i64: 1, 2, 1>, scalar_prefetch = 0 : i64, scratch_operands = 0 : i64, tpu.core_type = #tpu.core_type<tc>, window_params = [{transform_indices = @transform_0, window_bounds = array<i64: 1, 4, 256>}, {transform_indices = @transform_1, window_bounds = array<i64: 1, 1, 256>}, {transform_indices = @transform_2, window_bounds = array<i64: 1, 1, 4, 1>}, {transform_indices = @transform_3, window_bounds = array<i64: 1, 1, 4, 1>}, {transform_indices = @transform_4, window_bounds = array<i64: 1, 1, 4, 1>}, {transform_indices = @transform_5, window_bounds = array<i64: 1, 1, 1, 1>}]} {
    %c0_i32 = arith.constant 0 : i32
    %0 = arith.cmpi eq, %arg2, %c0_i32 : i32
    %1 = arith.extui %0 : i1 to i32
    %c0_i32_0 = arith.constant 0 : i32
    %2 = arith.cmpi ne, %1, %c0_i32_0 : i32
    scf.if %2 {
      %cst_46 = arith.constant 0.000000e+00 : f32
      %75 = vector.broadcast %cst_46 : f32 to vector<4x1xf32>
      %c0_47 = arith.constant 0 : index
      %c0_48 = arith.constant 0 : index
      %c0_49 = arith.constant 0 : index
      %c0_50 = arith.constant 0 : index
      %76 = vector.load %arg5[%c0_47, %c0_48, %c0_49, %c0_50] : memref<1x1x4x1xf32, #tpu.memory_space<vmem>>, vector<1x1x4x1xf32>
      %77 = vector.shape_cast %76 : vector<1x1x4x1xf32> to vector<4x1xf32>
      %78 = vector.shape_cast %75 : vector<4x1xf32> to vector<1x1x4x1xf32>
      tpu.vector_store %arg5[%c0_47, %c0_48, %c0_49, %c0_50], %78 {strides = array<i32>} : memref<1x1x4x1xf32, #tpu.memory_space<vmem>>, vector<1x1x4x1xf32>,
      %cst_51 = arith.constant 0.000000e+00 : f32
      %79 = vector.broadcast %cst_51 : f32 to vector<4x1xf32>
      %c0_52 = arith.constant 0 : index
      %c0_53 = arith.constant 0 : index
      %c0_54 = arith.constant 0 : index
      %c0_55 = arith.constant 0 : index
      %80 = vector.load %arg6[%c0_52, %c0_53, %c0_54, %c0_55] : memref<1x1x4x1xf32, #tpu.memory_space<vmem>>, vector<1x1x4x1xf32>
      %81 = vector.shape_cast %80 : vector<1x1x4x1xf32> to vector<4x1xf32>
      %82 = vector.shape_cast %79 : vector<4x1xf32> to vector<1x1x4x1xf32>
      tpu.vector_store %arg6[%c0_52, %c0_53, %c0_54, %c0_55], %82 {strides = array<i32>} : memref<1x1x4x1xf32, #tpu.memory_space<vmem>>, vector<1x1x4x1xf32>,
      %cst_56 = arith.constant 0.000000e+00 : f32
      %83 = vector.broadcast %cst_56 : f32 to vector<4x1xf32>
      %c0_57 = arith.constant 0 : index
      %c0_58 = arith.constant 0 : index
      %c0_59 = arith.constant 0 : index
      %c0_60 = arith.constant 0 : index
      %84 = vector.load %arg7[%c0_57, %c0_58, %c0_59, %c0_60] : memref<1x1x4x1xf32, #tpu.memory_space<vmem>>, vector<1x1x4x1xf32>
      %85 = vector.shape_cast %84 : vector<1x1x4x1xf32> to vector<4x1xf32>
      %86 = vector.shape_cast %83 : vector<4x1xf32> to vector<1x1x4x1xf32>
      tpu.vector_store %arg7[%c0_57, %c0_58, %c0_59, %c0_60], %86 {strides = array<i32>} : memref<1x1x4x1xf32, #tpu.memory_space<vmem>>, vector<1x1x4x1xf32>,
      %cst_61 = arith.constant 0.000000e+00 : f32
      %87 = vector.broadcast %cst_61 : f32 to vector<1x1xf32>
      %c0_62 = arith.constant 0 : index
      %c0_63 = arith.constant 0 : index
      %c0_64 = arith.constant 0 : index
      %c0_65 = arith.constant 0 : index
      %88 = vector.load %arg8[%c0_62, %c0_63, %c0_64, %c0_65] : memref<1x1x1x1xf32, #tpu.memory_space<vmem>>, vector<1x1x1x1xf32>
      %89 = vector.shape_cast %88 : vector<1x1x1x1xf32> to vector<1x1xf32>
      %90 = vector.shape_cast %87 : vector<1x1xf32> to vector<1x1x1x1xf32>
      tpu.vector_store %arg8[%c0_62, %c0_63, %c0_64, %c0_65], %90 {strides = array<i32>} : memref<1x1x1x1xf32, #tpu.memory_space<vmem>>, vector<1x1x1x1xf32>,
    } else {
    }
    %c0 = arith.constant 0 : index
    %c0_1 = arith.constant 0 : index
    %c0_2 = arith.constant 0 : index
    %3 = vector.load %arg3[%c0, %c0_1, %c0_2] : memref<1x4x256xf32, #tpu.memory_space<vmem>>, vector<1x4x256xf32>
    %4 = vector.shape_cast %3 : vector<1x4x256xf32> to vector<4x256xf32>
    %c1_i32 = arith.constant 1 : i32
    %5 = arith.muli %arg0, %c1_i32 : i32
    %6 = arith.addi %5, %arg2 : i32
    %7 = tpu.iota {dimensions = array<i32: 1>} : vector<1x256xi32>
    %c256_i32 = arith.constant 256 : i32
    %8 = arith.muli %6, %c256_i32 : i32
    %9 = vector.broadcast %8 : i32 to vector<1x256xi32>
    %10 = arith.addi %9, %7 : vector<1x256xi32>
    %c256_i32_3 = arith.constant 256 : i32
    %11 = vector.broadcast %c256_i32_3 : i32 to vector<1x256xi32>
    %12 = arith.cmpi slt, %10, %11 : vector<1x256xi32>
    %c0_4 = arith.constant 0 : index
    %c0_5 = arith.constant 0 : index
    %c0_6 = arith.constant 0 : index
    %13 = vector.load %arg4[%c0_4, %c0_5, %c0_6] : memref<1x1x256xi32, #tpu.memory_space<vmem>>, vector<1x1x256xi32>
    %14 = vector.shape_cast %13 : vector<1x1x256xi32> to vector<1x256xi32>
    %c255_i32 = arith.constant 255 : i32
    %15 = vector.broadcast %c255_i32 : i32 to vector<1x256xi32>
    %16 = arith.cmpi ne, %14, %15 : vector<1x256xi32>
    %17 = arith.andi %16, %12 : vector<1x256xi1>
    %cst = arith.constant dense<0xFF800000> : vector<256xf32>
    %18 = vector.multi_reduction <maximumf>, %4, %cst [0] : vector<4x256xf32> to vector<256xf32>
    %19 = vector.shape_cast %18 : vector<256xf32> to vector<1x256xf32>
    %20 = vector.broadcast %19 : vector<1x256xf32> to vector<4x256xf32>
    %21 = arith.subf %4, %20 : vector<4x256xf32>
    %22 = math.exp %21 : vector<4x256xf32>
    %cst_7 = arith.constant dense<0.000000e+00> : vector<256xf32>
    %23 = vector.multi_reduction <add>, %22, %cst_7 [0] : vector<4x256xf32> to vector<256xf32>
    %24 = vector.shape_cast %23 : vector<256xf32> to vector<1x256xf32>
    %25 = tpu.reciprocal %24 : vector<1x256xf32> -> vector<1x256xf32>
    %26 = vector.broadcast %25 : vector<1x256xf32> to vector<4x256xf32>
    %27 = arith.mulf %22, %26 : vector<4x256xf32>
    %28 = tpu.iota {dimensions = array<i32: 0>} : vector<4x256xi32>
    %29 = vector.broadcast %14 : vector<1x256xi32> to vector<4x256xi32>
    %30 = arith.cmpi eq, %29, %28 : vector<4x256xi32>
    %31 = vector.broadcast %17 : vector<1x256xi1> to vector<4x256xi1>
    %32 = arith.andi %30, %31 : vector<4x256xi1>
    %cst_8 = arith.constant 0.000000e+00 : f32
    %33 = vector.shape_cast %17 : vector<1x256xi1> to vector<1x256xi1>
    %34 = vector.broadcast %33 : vector<1x256xi1> to vector<4x256xi1>
    %35 = vector.broadcast %cst_8 : f32 to vector<4x256xf32>
    %36 = arith.select %34, %27, %35 : vector<4x256xi1>, vector<4x256xf32>
    %cst_9 = arith.constant 0.000000e+00 : f32
    %37 = vector.broadcast %cst_9 : f32 to vector<4x256xf32>
    %38 = arith.select %32, %27, %37 : vector<4x256xi1>, vector<4x256xf32>
    %39 = arith.extui %32 : vector<4x256xi1> to vector<4x256xi32>
    %40 = arith.sitofp %39 : vector<4x256xi32> to vector<4x256xf32>
    %c0_10 = arith.constant 0 : index
    %c0_11 = arith.constant 0 : index
    %c0_12 = arith.constant 0 : index
    %c0_13 = arith.constant 0 : index
    %41 = vector.load %arg5[%c0_10, %c0_11, %c0_12, %c0_13] : memref<1x1x4x1xf32, #tpu.memory_space<vmem>>, vector<1x1x4x1xf32>
    %42 = vector.shape_cast %41 : vector<1x1x4x1xf32> to vector<4x1xf32>
    %cst_14 = arith.constant dense<0.000000e+00> : vector<4xf32>
    %43 = vector.multi_reduction <add>, %38, %cst_14 [1] : vector<4x256xf32> to vector<4xf32>
    %44 = vector.shape_cast %43 : vector<4xf32> to vector<4x1xf32>
    %45 = arith.addf %42, %44 : vector<4x1xf32>
    %c0_15 = arith.constant 0 : index
    %c0_16 = arith.constant 0 : index
    %c0_17 = arith.constant 0 : index
    %c0_18 = arith.constant 0 : index
    %46 = vector.load %arg5[%c0_15, %c0_16, %c0_17, %c0_18] : memref<1x1x4x1xf32, #tpu.memory_space<vmem>>, vector<1x1x4x1xf32>
    %47 = vector.shape_cast %46 : vector<1x1x4x1xf32> to vector<4x1xf32>
    %48 = vector.shape_cast %45 : vector<4x1xf32> to vector<1x1x4x1xf32>
    tpu.vector_store %arg5[%c0_15, %c0_16, %c0_17, %c0_18], %48 {strides = array<i32>} : memref<1x1x4x1xf32, #tpu.memory_space<vmem>>, vector<1x1x4x1xf32>,
    %c0_19 = arith.constant 0 : index
    %c0_20 = arith.constant 0 : index
    %c0_21 = arith.constant 0 : index
    %c0_22 = arith.constant 0 : index
    %49 = vector.load %arg6[%c0_19, %c0_20, %c0_21, %c0_22] : memref<1x1x4x1xf32, #tpu.memory_space<vmem>>, vector<1x1x4x1xf32>
    %50 = vector.shape_cast %49 : vector<1x1x4x1xf32> to vector<4x1xf32>
    %cst_23 = arith.constant dense<0.000000e+00> : vector<4xf32>
    %51 = vector.multi_reduction <add>, %36, %cst_23 [1] : vector<4x256xf32> to vector<4xf32>
    %52 = vector.shape_cast %51 : vector<4xf32> to vector<4x1xf32>
    %53 = arith.addf %50, %52 : vector<4x1xf32>
    %c0_24 = arith.constant 0 : index
    %c0_25 = arith.constant 0 : index
    %c0_26 = arith.constant 0 : index
    %c0_27 = arith.constant 0 : index
    %54 = vector.load %arg6[%c0_24, %c0_25, %c0_26, %c0_27] : memref<1x1x4x1xf32, #tpu.memory_space<vmem>>, vector<1x1x4x1xf32>
    %55 = vector.shape_cast %54 : vector<1x1x4x1xf32> to vector<4x1xf32>
    %56 = vector.shape_cast %53 : vector<4x1xf32> to vector<1x1x4x1xf32>
    tpu.vector_store %arg6[%c0_24, %c0_25, %c0_26, %c0_27], %56 {strides = array<i32>} : memref<1x1x4x1xf32, #tpu.memory_space<vmem>>, vector<1x1x4x1xf32>,
    %c0_28 = arith.constant 0 : index
    %c0_29 = arith.constant 0 : index
    %c0_30 = arith.constant 0 : index
    %c0_31 = arith.constant 0 : index
    %57 = vector.load %arg7[%c0_28, %c0_29, %c0_30, %c0_31] : memref<1x1x4x1xf32, #tpu.memory_space<vmem>>, vector<1x1x4x1xf32>
    %58 = vector.shape_cast %57 : vector<1x1x4x1xf32> to vector<4x1xf32>
    %cst_32 = arith.constant dense<0.000000e+00> : vector<4xf32>
    %59 = vector.multi_reduction <add>, %40, %cst_32 [1] : vector<4x256xf32> to vector<4xf32>
    %60 = vector.shape_cast %59 : vector<4xf32> to vector<4x1xf32>
    %61 = arith.addf %58, %60 : vector<4x1xf32>
    %c0_33 = arith.constant 0 : index
    %c0_34 = arith.constant 0 : index
    %c0_35 = arith.constant 0 : index
    %c0_36 = arith.constant 0 : index
    %62 = vector.load %arg7[%c0_33, %c0_34, %c0_35, %c0_36] : memref<1x1x4x1xf32, #tpu.memory_space<vmem>>, vector<1x1x4x1xf32>
    %63 = vector.shape_cast %62 : vector<1x1x4x1xf32> to vector<4x1xf32>
    %64 = vector.shape_cast %61 : vector<4x1xf32> to vector<1x1x4x1xf32>
    tpu.vector_store %arg7[%c0_33, %c0_34, %c0_35, %c0_36], %64 {strides = array<i32>} : memref<1x1x4x1xf32, #tpu.memory_space<vmem>>, vector<1x1x4x1xf32>,
    %c0_37 = arith.constant 0 : index
    %c0_38 = arith.constant 0 : index
    %c0_39 = arith.constant 0 : index
    %c0_40 = arith.constant 0 : index
    %65 = vector.load %arg8[%c0_37, %c0_38, %c0_39, %c0_40] : memref<1x1x1x1xf32, #tpu.memory_space<vmem>>, vector<1x1x1x1xf32>
    %66 = vector.shape_cast %65 : vector<1x1x1x1xf32> to vector<1x1xf32>
    %67 = arith.extui %17 : vector<1x256xi1> to vector<1x256xi32>
    %68 = arith.sitofp %67 : vector<1x256xi32> to vector<1x256xf32>
    %cst_41 = arith.constant dense<0.000000e+00> : vector<1xf32>
    %69 = vector.multi_reduction <add>, %68, %cst_41 [1] : vector<1x256xf32> to vector<1xf32>
    %70 = vector.shape_cast %69 : vector<1xf32> to vector<1x1xf32>
    %71 = arith.addf %66, %70 : vector<1x1xf32>
    %c0_42 = arith.constant 0 : index
    %c0_43 = arith.constant 0 : index
    %c0_44 = arith.constant 0 : index
    %c0_45 = arith.constant 0 : index
    %72 = vector.load %arg8[%c0_42, %c0_43, %c0_44, %c0_45] : memref<1x1x1x1xf32, #tpu.memory_space<vmem>>, vector<1x1x1x1xf32>
    %73 = vector.shape_cast %72 : vector<1x1x1x1xf32> to vector<1x1xf32>
    %74 = vector.shape_cast %71 : vector<1x1xf32> to vector<1x1x1x1xf32>
    tpu.vector_store %arg8[%c0_42, %c0_43, %c0_44, %c0_45], %74 {strides = array<i32>} : memref<1x1x1x1xf32, #tpu.memory_space<vmem>>, vector<1x1x1x1xf32>,
    return
  }
  func.func @transform_0(%arg0: i32, %arg1: i32, %arg2: i32) -> (i32, i32, i32) {
    %c1_i32 = arith.constant 1 : i32
    %0 = arith.muli %arg0, %c1_i32 : i32
    %1 = arith.addi %0, %arg2 : i32
    %c0_i32 = arith.constant 0 : i32
    %2 = arith.minsi %1, %c0_i32 : i32
    %c0_i32_0 = arith.constant 0 : i32
    %c0_i32_1 = arith.constant 0 : i32
    return %arg1, %c0_i32_0, %2 : i32, i32, i32
  }
  func.func @transform_1(%arg0: i32, %arg1: i32, %arg2: i32) -> (i32, i32, i32) {
    %c1_i32 = arith.constant 1 : i32
    %0 = arith.muli %arg0, %c1_i32 : i32
    %1 = arith.addi %0, %arg2 : i32
    %c0_i32 = arith.constant 0 : i32
    %2 = arith.minsi %1, %c0_i32 : i32
    %c0_i32_0 = arith.constant 0 : i32
    %c0_i32_1 = arith.constant 0 : i32
    return %arg1, %c0_i32_0, %2 : i32, i32, i32
  }
  func.func @transform_2(%arg0: i32, %arg1: i32, %arg2: i32) -> (i32, i32, i32, i32) {
    %c0_i32 = arith.constant 0 : i32
    %c0_i32_0 = arith.constant 0 : i32
    %c0_i32_1 = arith.constant 0 : i32
    return %arg0, %arg1, %c0_i32, %c0_i32_0 : i32, i32, i32, i32
  }
  func.func @transform_3(%arg0: i32, %arg1: i32, %arg2: i32) -> (i32, i32, i32, i32) {
    %c0_i32 = arith.constant 0 : i32
    %c0_i32_0 = arith.constant 0 : i32
    %c0_i32_1 = arith.constant 0 : i32
    return %arg0, %arg1, %c0_i32, %c0_i32_0 : i32, i32, i32, i32
  }
  func.func @transform_4(%arg0: i32, %arg1: i32, %arg2: i32) -> (i32, i32, i32, i32) {
    %c0_i32 = arith.constant 0 : i32
    %c0_i32_0 = arith.constant 0 : i32
    %c0_i32_1 = arith.constant 0 : i32
    return %arg0, %arg1, %c0_i32, %c0_i32_0 : i32, i32, i32, i32
  }
  func.func @transform_5(%arg0: i32, %arg1: i32, %arg2: i32) -> (i32, i32, i32, i32) {
    %c0_i32 = arith.constant 0 : i32
    %c0_i32_0 = arith.constant 0 : i32
    %c0_i32_1 = arith.constant 0 : i32
    return %arg0, %arg1, %c0_i32, %c0_i32_0 : i32, i32, i32, i32
  }
}

</mosaic_0001>

<bundles_post_ra>
// kernel: tpu_custom_call.1
= control target key start
LH: loop header
LB: loop body
LE: loop exit
PB: predicated region body
PF: predicated region fallthrough
CT: control target
= control target key end

     0   :  { %11 = vsyncpa [#allocation3], 0  ;;  %s1311_s0 = inlined_call_operand.hbm [shape: f32[2,4,256], index: 0, kind: input, shape index: {}]   ;;  %s1312_s1 = inlined_call_operand.hbm [shape: s32[2,1,256], index: 1, kind: input, shape index: {}]   ;;  %s1313_s2 = inlined_call_operand.vmem [shape: f32[1,2,4,1], index: 2, kind: output, shape index: {0}]   ;;  %s1314_s3 = inlined_call_operand.vmem [shape: f32[1,2,4,1], index: 3, kind: output, shape index: {1}]   ;;  %s1315_s4 = inlined_call_operand.vmem [shape: f32[1,2,4,1], index: 4, kind: output, shape index: {2}]   ;;  %s1316_s5 = inlined_call_operand.vmem [shape: f32[1,2,1,1], index: 5, kind: output, shape index: {3}]  }
   0x1   :  { %13 = vsyncpa [#allocation3 + $0x1], 0 }
   0x2   :  { %14 = vsyncpa [#allocation5], 0 }
   0x3   :  { %16 = vsyncpa [#allocation5 + $0x1], 0  ;;  %s1083_s18 = smov 0   ;;  %s1085_s19 = smov 0  }
   0x4   :  { %s1087_s20 = smov 0   ;;  %s1089_s21 = smov 0  }
   0x5   :  { %s1091_s22 = smov 0   ;;  %s1093_s23 = smov 0  }
   0x6 LB: > { %s844_s24 = sadd.s32 4294967295, %s1048_s23   ;;  %s37_s25 = sadd.s32 1, %s1044_s22  ;;  %s1048_s23 = sphi %s1093_s23, %s22_s23   ;;  %s1044_s22 = sphi %s1091_s22, %s1338_s22   ;;  %s1040_s21 = sphi %s1089_s21, %s1337_s21   ;;  %s1036_s20 = sphi %s1087_s20, %s1336_s20   ;;  %s1032_s19 = sphi %s1085_s19, %s1335_s19   ;;  %s1028_s18 = sphi %s1083_s18, %s1334_s18  }
   0x7   : > { %p39_p0 = scmp.ge.s32.totalorder %s37_s25, 2  ;;  %s56_s26 = sadd.s32 1, %s1036_s20 }
   0x8   : > { %p63_p1 = scmp.ne.s32.totalorder %s1036_s20, %s1032_s19  ;;  %p64_p2 = scmp.eq.s32.totalorder %s1048_s23, 0 }
   0x9   : > { %s1340_s25 = smov (%p39_p0, %s37_s25), 0  ;;  %p69_p4 = scmp.ne.s32.totalorder %s1032_s19, %s1028_s18 }
   0xa   : > { %p1119_p3 = por %p64_p2, %p63_p1  ;;  %s51_s28 = ssub.s32 %s1044_s22, %s1340_s25 }
   0xb   : > { %p70_p5 = scmp.eq.s32.totalorder %s844_s24, 0  ;;  %p54_p6 = scmp.eq.s32.totalorder %s51_s28, 0 }
   0xc   : > { %p876_p8 = scmp.lt.s32.totalorder %s1048_s23, 2  ;;  %s239_s6 = sand.u32 1, %s1036_s20  }
   0xd   : > { %p1126_p7 = por %p70_p5, %p69_p4  ;;  %s864_s7 = sshll.u32 %s1044_s22, 3 }
   0xe   : > { %s1132_s30 = scalar_select %p54_p6, %s1036_s20, %s56_s26  }
   0xf   : > { %s848_s8 = sshll.u32 %s239_s6, 3  ;;  %s253_s11 = scalar_lea.hbm %s1311_s0, %s864_s7 }
  0x10   : > { %s255_s12 = sshll.u32 %s253_s11, 4  ;;  %s243_s13 = scalar_lea.vmem [#allocation2], %s848_s8  ;;  %s256_s12 = int_to_ptr.hbm [resolvable:$true] %s255_s12 }
  0x11   : > { %s257_s14 = sshll.u32 %s243_s13, 4  ;;  %p1141_p9 = pnand %p876_p8, %p1119_p3  ;;  %s258_s14 = int_to_ptr.vmem [resolvable:$true] %s257_s14 }
  0x12   : > { %p853_p10 = scmp.ge.s32.totalorder %s1048_s23, 1  ;;  %p286_p11 = scmp.lt.s32.totalorder %s1048_s23, 3 }
  0x13   : > { %s851_s16 = sshll.u32 %s239_s6, 1  ;;  %s240_s17 = scalar_lea.sflag [#allocation3], %s239_s6 }
  0x14   : > { %872 = dma.hbm_to_vmem [thread:$0]  (!%p1141_p9), %s256_s12, 128, %s258_s14, %s240_s17  }
  0x15   : > { %p287_p12 = pnand %p853_p10, %p286_p11  ;;  %s852_s18 = sshll.u32 %s1044_s22, 1 }
  0x16   : > { %s268_s24 = scalar_lea.vmem [#allocation4], %s851_s16  ;;  %s277_s27 = scalar_lea.hbm %s1312_s1, %s852_s18 }
  0x17   : > { %s281_s26 = sshll.u32 %s268_s24, 4  ;;  %s279_s8 = sshll.u32 %s277_s27, 4  ;;  %s282_s26 = int_to_ptr.vmem [resolvable:$true] %s281_s26  ;;  %s280_s8 = int_to_ptr.hbm [resolvable:$true] %s279_s8 }
  0x18   : > { %s265_s9 = scalar_lea.sflag [#allocation5], %s239_s6  ;;  %290 = sbr.rel (%p287_p12) target bundleno = 260 (0x104), region = 28 }
  0x19   : > { %875 = dma.hbm_to_vmem [thread:$0]  (!%p1141_p9), %s280_s8, 32, %s282_s26, %s265_s9  }
  0x1a   : > { %s292_s10 = sand.u32 (!%p287_p12), 1, %s1032_s19  }
  0x1b   : > { %s854_s11 = sshll.u32 (!%p287_p12), %s292_s10, 3  ;;  %s293_s12 = scalar_lea.sflag (!%p287_p12), [#allocation3], %s292_s10 }
  0x1c   : > { %s296_s13 = scalar_lea.vmem (!%p287_p12), [#allocation2], %s854_s11 }
  0x1d   : > { %1019 = dma.done.wait (%p1126_p7), %s293_s12, 128  }
  0x1e   : > { %1021 = vsyncadd (%p1126_p7), %s293_s12, 4294967168  ;;  %s855_s14 = sshll.u32 %s292_s10, 1  ;;  %s303_s16 = scalar_lea.sflag [#allocation5], %s292_s10 }
  0x1f   : > { %s306_s17 = scalar_lea.vmem [#allocation4], %s855_s14 }
  0x20   : > { %1023 = dma.done.wait (%p1126_p7), %s303_s16, 32  }
  0x21   : > { %1025 = vsyncadd (%p1126_p7), %s303_s16, 4294967264  ;;  %vm430_vm0 = vcmask 1040384   ;;  %v1050_v0 = vmov 1   ;;  %v517_v3 = vlaneseq  ;;  %v425_v4 = vld [vmem:[%s306_s17] sm:$0x3]  ;;  %v414_v6 = vld [vmem:[%s296_s13] sm:$0xff] }
  0x22   : > { %v429_v1 = vrot.slane %v1050_v0, 7  ;;  %vm426_vm2 = vcmp.ne.s32.totalorder %v425_v4, 255  ;;  %v519_v7 = vperm.slane %v425_v4, 0  ;;  %v520_v8 = vperm.slane %v425_v4, 1  ;;  %435 = vst [vmem:[#allocation1] ss:$2 sm:$0xff] %v414_v6 }
  0x23   : > { %v518_v5 = vshrl.u32 %v517_v3, 7  ;;  %v1051_v10 = vmov 0   ;;  %vm440_vm8 = vcmask 1043456   ;;  %v1052_v18 = vmov 0.0   ;;  %p375_p13 = scmp.lt.s32.totalorder %s1040_s21, 1 }
  0x24   : > { %v431_v2 = vsel %vm430_vm0, 1, %v429_v1 }
  0x25   : > { %vm432_vm1 = vcmp.ne.s32.totalorder %v431_v2, 0  ;;  %vm1171_vm4 = vcmp.eq.s32.totalorder %v519_v7, %v518_v5  ;;  %vm1175_vm5 = vcmp.eq.s32.totalorder %v520_v8, %v518_v5  ;;  %s1342_s21 = smov (!%p375_p13, %s1040_s21), 1 }
  0x26   : > { %vm1165_vm3 = vmand %vm426_vm2, %vm432_vm1  ;;  %s856_s29 = sshll.u32 %s1342_s21, 2  ;;  %s403_s11 = scalar_lea.vmem %s1316_s5, %s1342_s21 }
  0x27   : > { %v523_v11 = vsel %vm1165_vm3, 1, %v1051_v10  ;;  %v861_v8 = vsel %vm1165_vm3, 1.0, %v1052_v18  ;;  %s1238_s18 = scalar_lea.vmem %s1315_s4, %s856_s29  ;;  %s1243_s28 = scalar_lea.vmem %s1313_s2, %s856_s29 }
  0x28   : > { %v524_v13 = vperm.slane %v523_v11, 0  ;;  %v525_v14 = vperm.slane %v523_v11, 1  ;;  %s1256_s8 = scalar_lea.vmem %s1314_s3, %s856_s29 }
  0x29   : > { %v436_v20 = vld.sshfl [vmem:[#allocation1] sm:$0xff pattern:$0x75316420]  ;;  %v437_v23 = vld.sshfl [vmem:[#allocation1 + $0x8] sm:$0xff pattern:$0x75316420] }
  0x2a   : > { %vm1179_vm6 = vcmp.eq.s32.totalorder %v524_v13, 1  ;;  %vm1183_vm7 = vcmp.eq.s32.totalorder %v525_v14, 1  ;;  %v441_v24 = vsel %vm440_vm8, %v436_v20, -inf  ;;  %v448_v27 = vsel %vm440_vm8, %v437_v23, -inf }
  0x2b   : > { %vm528_vm9 = vmand %vm1171_vm4, %vm1179_vm6  ;;  %v442_v26 = vrot.slane %v441_v24, 4  ;;  %v449_v29 = vrot.slane %v448_v27, 4  ;;  %v577_v13 = vperm.slane %v861_v8, 0  ;;  %v578_v14 = vperm.slane %v861_v8, 1 }
  0x2c   : > { %vm1317_vm10 = vmand %vm1175_vm5, %vm1183_vm7  ;;  %v859_v19 = vsel %vm528_vm9, 1.0, %v1052_v18  ;;  %vm412_vm4 = vcmask 0  }
  0x2d   : > { %v860_v21 = vsel %vm1317_vm10, 1.0, %v1052_v18  ;;  %v567_v22 = vsel %vm440_vm8, %v859_v19, 0.0  ;;  %v443_v30 = vmax.f32 %v441_v24, %v442_v26  ;;  %v450_v31 = vmax.f32 %v448_v27, %v449_v29  ;;  %vm1333_vm3 = vmand %vm1175_vm5, %vm1183_vm7  ;;  %413 = vst.msk [vmem:[%s403_s11] sm:$0x1] %vm412_vm4, %v1052_v18 }
  0x2e   : > { %v568_v25 = vsel %vm440_vm8, %v860_v21, 0.0  ;;  %v581_v23 = vsel %vm430_vm0, %v577_v13, 0.0  ;;  %v582_v24 = vsel %vm430_vm0, %v578_v14, 0.0  ;;  %vm408_vm0 = vcmask 3072  }
  0x2f   : > { %v569_v28 = vadd.f32 %v568_v25, %v567_v22  ;;  %v444_v32 = vrot.slane %v443_v30, 2  ;;  %v451_v33 = vrot.slane %v450_v31, 2  ;;  %v583_v25 = vadd.f32 %v582_v24, %v581_v23  ;;  %411 = vst.msk [vmem:[%s1238_s18] sm:$0xf] %vm408_vm0, %v1052_v18 }
  0x30   : > { %409 = vst.msk [vmem:[%s1243_s28] sm:$0xf] %vm408_vm0, %v1052_v18 }
  0x31   : > { %570 = vadd.xlane.f32.xlu1 %v569_v28  ;;  %v445_v34 = vmax.f32 %v443_v30, %v444_v32  ;;  %v452_v35 = vmax.f32 %v450_v31, %v451_v33  ;;  %410 = vst.msk [vmem:[%s1256_s8] sm:$0xf] %vm408_vm0, %v1052_v18 }
  0x33   : > { %v446_v36 = vrot.slane %v445_v34, 1  ;;  %v453_v37 = vrot.slane %v452_v35, 1 }
  0x34   : > { %v574_v17 = vld [vmem:[%s403_s11] sm:$0x1] }
  0x35   : > { %v447_v38 = vmax.f32 %v445_v34, %v446_v36  ;;  %v454_v39 = vmax.f32 %v452_v35, %v453_v37 }
  0x37   : > { %v457_v40 = vrot.slane %v454_v39, 4 }
  0x39   : > { %v458_v41 = vsel %vm440_vm8, %v447_v38, %v457_v40  ;;  %584 = vadd.xlane.f32.xlu1 %v583_v25 }
  0x3a   : > { %v460_v42 = vsub.f32 %v414_v6, %v458_v41 }
  0x3c   : > { %v461_v43 = vmul.f32 1.442695, %v460_v42 }
  0x3e   : > { %928 = vpow2.f32 %v461_v43 }
  0x44   : > { %v1212_v44 = vpop.eup %928 }
  0x45   : > { %464 = vst [vmem:[#allocation1] ss:$2 sm:$0xff] %v1212_v44 }
  0x4c   : > { %v465_v45 = vld.sshfl [vmem:[#allocation1] sm:$0xff pattern:$0x75316420]  ;;  %v466_v46 = vld.sshfl [vmem:[#allocation1 + $0x8] sm:$0xff pattern:$0x75316420] }
  0x4d   : > { %v469_v47 = vsel %vm440_vm8, %v465_v45, 0.0  ;;  %v476_v48 = vsel %vm440_vm8, %v466_v46, 0.0 }
  0x4e   : > { %v470_v49 = vrot.slane %v469_v47, 4  ;;  %v477_v50 = vrot.slane %v476_v48, 4 }
  0x50   : > { %v471_v51 = vadd.f32 %v470_v49, %v469_v47  ;;  %v478_v52 = vadd.f32 %v477_v50, %v476_v48  ;;  %v549_v48 = vld [vmem:[%s1243_s28] sm:$0xf] }
  0x52   : > { %v472_v53 = vrot.slane %v471_v51, 2  ;;  %v479_v54 = vrot.slane %v478_v52, 2 }
  0x54   : > { %v473_v55 = vadd.f32 %v472_v53, %v471_v51  ;;  %v480_v56 = vadd.f32 %v479_v54, %v478_v52  ;;  %v558_v51 = vld [vmem:[%s1256_s8] sm:$0xf] }
  0x56   : > { %v474_v57 = vrot.slane %v473_v55, 1  ;;  %v481_v58 = vrot.slane %v480_v56, 1 }
  0x58   : > { %v475_v59 = vadd.f32 %v474_v57, %v473_v55  ;;  %v482_v60 = vadd.f32 %v481_v58, %v480_v56 }
  0x5a   : > { %930 = vrcp.f32 %v475_v59  ;;  %vm488_vm11 = vweird.f32 %v475_v59  ;;  %v492_v0 = vand.u32 2147483647, %v475_v59  ;;  %v494_v3 = vand.u32 2147483648, %v475_v59 }
  0x5b   : > { %932 = vrcp.f32 %v482_v60  ;;  %v508_v4 = vand.u32 2147483648, %v482_v60  ;;  %vm502_vm13 = vweird.f32 %v482_v60  ;;  %v506_v6 = vand.u32 2147483647, %v482_v60 }
  0x5c   : > { %vm493_vm1 = vcmp.eq.f32.partialorder %v492_v0, 8.507059e+37  ;;  %v495_v20 = vor.u32 1.1754944e-38, %v494_v3 }
  0x5d   : > { %v509_v21 = vor.u32 1.1754944e-38, %v508_v4  ;;  %vm507_vm10 = vcmp.eq.f32.partialorder %v506_v6, 8.507059e+37 }
  0x60   : > { %v931_v61 = vpop.eup %930 }
  0x61   : > { %v933_v62 = vpop.eup %932  ;;  %v484_v63 = vmul.f32 %v931_v61, %v475_v59  ;;  %vm489_vm12 = vweird.f32 %v931_v61 }
  0x62   : > { %v498_v1 = vmul.f32 %v933_v62, %v482_v60  ;;  %vm503_vm14 = vweird.f32 %v933_v62  ;;  %vm1226_vm15 = vmor %vm488_vm11, %vm489_vm12 }
  0x63   : > { %v485_v2 = vsub.f32 1.0, %v484_v63  ;;  %vm504_vm2 = vmor %vm502_vm13, %vm503_vm14 }
  0x64   : > { %v499_v5 = vsub.f32 1.0, %v498_v1 }
  0x65   : > { %v486_v7 = vmul.f32 %v931_v61, %v485_v2 }
  0x66   : > { %v500_v11 = vmul.f32 %v933_v62, %v499_v5 }
  0x67   : > { %v487_v19 = vadd.f32 %v931_v61, %v486_v7 }
  0x68   : > { %v501_v22 = vadd.f32 %v933_v62, %v500_v11 }
  0x69   : > { %v491_v9 = vsel %vm1226_vm15, %v931_v61, %v487_v19 }
  0x6a   : > { %v505_v26 = vsel %vm504_vm2, %v933_v62, %v501_v22  ;;  %v496_v27 = vsel %vm493_vm1, %v495_v20, %v491_v9 }
  0x6b   : > { %v510_v28 = vsel %vm507_vm10, %v509_v21, %v505_v26 }
  0x6c   : > { %v513_v29 = vrot.slane %v510_v28, 4 }
  0x6e   : > { %v514_v30 = vsel %vm440_vm8, %v496_v27, %v513_v29 }
  0x6f   : > { %v516_v31 = vmul.f32 %v1212_v44, %v514_v30  ;;  %v566_v44 = vld [vmem:[%s1238_s18] sm:$0xf] }
  0x71   : > { %531 = vst [vmem:[#allocation1] ss:$2 sm:$0xff] %v516_v31 }
  0x78   : > { %v532_v32 = vld.sshfl [vmem:[#allocation1] sm:$0xff pattern:$0x75316420]  ;;  %v533_v33 = vld.sshfl [vmem:[#allocation1 + $0x8] sm:$0xff pattern:$0x75316420] }
  0x79   : > { %538 = vst [vmem:[#allocation1] ss:$2 sm:$0xff] %v516_v31  ;;  %v536_v12 = vsel %vm1179_vm6, %v532_v32, 0.0  ;;  %v537_v41 = vsel %vm1183_vm7, %v533_v33, 0.0 }
  0x7a   : > { %v559_v15 = vsel %vm440_vm8, %v536_v12, 0.0  ;;  %v560_v42 = vsel %vm440_vm8, %v537_v41, 0.0 }
  0x7b   : > { %v561_v43 = vadd.f32 %v560_v42, %v559_v15 }
  0x80   : > { %v539_v34 = vld.sshfl [vmem:[#allocation1] sm:$0xff pattern:$0x75316420]  ;;  %v540_v35 = vld.sshfl [vmem:[#allocation1 + $0x8] sm:$0xff pattern:$0x75316420] }
  0x81   : > { %v543_v36 = vsel %vm528_vm9, %v539_v34, 0.0  ;;  %v544_v37 = vsel %vm1333_vm3, %v540_v35, 0.0 }
  0x82   : > { %v550_v38 = vsel %vm440_vm8, %v543_v36, 0.0  ;;  %v551_v39 = vsel %vm440_vm8, %v544_v37, 0.0 }
  0x83   : > { %v552_v40 = vadd.f32 %v551_v39, %v550_v38 }
  0x85   : > { %553 = vadd.xlane.f32.xlu0 %v552_v40 }
  0x8d   : > { %562 = vadd.xlane.f32.xlu0 %v561_v43 }
  0xa4   : > { %v571_v45 = vpop.xlane.xlu1 %570 }
  0xa5   : > { %v572_v46 = vadd.f32 %v571_v45, %v566_v44 }
  0xa7   : > { %573 = vst.msk [vmem:[%s1238_s18] sm:$0xf] %vm408_vm0, %v572_v46 }
  0xac   : > { %v585_v16 = vpop.xlane.xlu1 %584 }
  0xad   : > { %v586_v47 = vadd.f32 %v585_v16, %v574_v17 }
  0xaf   : > { %588 = vst.msk [vmem:[%s403_s11] sm:$0x1] %vm412_vm4, %v586_v47 }
  0xf8   : > { %v554_v49 = vpop.xlane.xlu0 %553 }
  0xf9   : > { %v555_v50 = vadd.f32 %v554_v49, %v549_v48 }
  0xfb   : > { %557 = vst.msk [vmem:[%s1243_s28] sm:$0xf] %vm408_vm0, %v555_v50 }
 0x100   : > { %v563_v52 = vpop.xlane.xlu0 %562 }
 0x101   : > { %v564_v53 = vadd.f32 %v563_v52, %v558_v51 }
 0x103   : > { %565 = vst.msk [vmem:[%s1256_s8] sm:$0xf] %vm408_vm0, %v564_v53 }
 0x104 PF: > { %s22_s23 = sadd.s32 1, %s1048_s23   ;;  %s1334_s18 = smov %s1032_s19 }
 0x105   : > { %p19_p0 = scmp.ge.s32.totalorder %s22_s23, 4   ;;  %s1335_s19 = smov %s1036_s20 }
 0x106   : > { %s1336_s20 = smov %s1132_s30  ;;  %s1337_s21 = smov %s1044_s22 }
 0x107   : > { %s1338_s22 = smov %s1340_s25  ;;  %21 = sbr.rel (!%p19_p0) target bundleno = 6 (0x6), region = 121 }
 0x10c   :  { %680 = vsyncpa [#allocation3], 1 }
 0x10d   :  { %682 = vsyncpa [#allocation3 + $0x1], 1 }
 0x10e   :  { %683 = vsyncpa [#allocation5], 1 }
 0x10f   :  { %685 = vsyncpa [#allocation5 + $0x1], 1 }

</bundles_post_ra>
